<compile_context>
chip_gen: v5e
topology: v5e:2x2
jax: 0.10.0
libtpu: 0.0.40
codegen_flags: <defaults>
</compile_context>

<pallas_src>
import functools

import jax
import jax.numpy as jnp
from jax import lax
from jax.experimental import pallas as pl
from jax.experimental.pallas import tpu as pltpu


# ---------------------------------------------------------------------------
# Kernel
# ---------------------------------------------------------------------------

def baseconv_kernel(pos_ref, x_ref, w1_ref, t1_ref, w2_ref, t2_ref, o_ref,
                    *, seg_len, valid_len, dot_dtype):
    x = x_ref[...].astype(jnp.float32)          # (C_in, T)
    T = x.shape[-1]
    last = x.ndim - 1                            # pltpu.roll needs a non-negative axis

    pos = pos_ref[...]                           # (1, T) int32: lane pos within segment
    keep_left = pos != 0                         # left conv zero-pad / segment boundary
    keep_right = pos < (valid_len - 1)           # right conv zero-pad (+ lane padding)

    def conv3(a, w_ref, t_ref):
        """k=3, pad=1 Conv1d (+ folded bias & eval BatchNorm) on a (C, T) slab.

        Three accumulating per-tap matmuls; taps built with XLU rolls + VPU
        masks (no concatenated (3C, T) temporary)."""
        a_m1 = jnp.where(keep_left, pltpu.roll(a, shift=1, axis=last), 0.0)      # a[l-1]
        a_p1 = jnp.where(keep_right, pltpu.roll(a, shift=T - 1, axis=last), 0.0)  # a[l+1]
        w = w_ref[...]                            # (3, O, C), already dot_dtype
        r = jnp.dot(w[0], a_m1.astype(dot_dtype), preferred_element_type=jnp.float32)
        r = r + jnp.dot(w[1], a.astype(dot_dtype), preferred_element_type=jnp.float32)
        r = r + jnp.dot(w[2], a_p1.astype(dot_dtype), preferred_element_type=jnp.float32)
        return r + t_ref[...]                     # folded bias + BN shift (f32)

    # conv1 + BN1 + ReLU
    y = jnp.maximum(conv3(x, w1_ref, t1_ref), 0.0)      # (C_mid, T) f32
    # conv2 + BN2, residual, ReLU (all f32)
    z = conv3(y, w2_ref, t2_ref)                         # (C_out, T) f32
    out = jnp.maximum(x + z, 0.0)

    if valid_len < seg_len:
        # Zero the padded lanes so the folded (C, N*Lp) layout can be chained
        # directly into another BaseConv block without re-masking.
        out = jnp.where(pos < valid_len, out, 0.0)

    o_ref[...] = out.astype(o_ref.dtype)


# ---------------------------------------------------------------------------
# Parameter folding + layout helpers (interchange format: (C, N*Lp))
# ---------------------------------------------------------------------------

def fold_base_conv_params(w1, b1, bn1, w2, b2, bn2, eps=1e-5, *,
                          dot_dtype=jnp.float32):
    """Fold conv bias + eval-mode BatchNorm into weights / per-channel shifts.

    wX: (O, C, 3) PyTorch Conv1d layout; bnX = (gamma, beta, mean, var).
    Returns (w1s, t1, w2s, t2) with wXs of shape (3, O, C) in dot_dtype and
    tX of shape (O, 1) in f32.
    """
    def fold(w, b, bn):
        gamma, beta, mean, var = bn
        scale = gamma / jnp.sqrt(var + eps)
        shift = beta - mean * scale
        # BN(conv(x)) = (scale*W) (*) x + (scale*b + shift)
        w_f = (w * scale[:, None, None]).astype(dot_dtype)   # (O, C, 3)
        w_s = jnp.transpose(w_f, (2, 0, 1))                   # (3, O, C): tap-major
        t = (scale * b + shift).reshape(-1, 1).astype(jnp.float32)
        return w_s, t

    w1s, t1 = fold(w1, b1, bn1)
    w2s, t2 = fold(w2, b2, bn2)
    return w1s, t1, w2s, t2


def _lane_pad(L):
    return ((L + 127) // 128) * 128


def fold_ncl_to_lanes(x, seg_len):
    """(N, C, L) -> (C, N*seg_len): batch folded onto the 128-lane axis."""
    N, C, L = x.shape
    if seg_len != L:
        x = jnp.pad(x, ((0, 0), (0, 0), (0, seg_len - L)))
    return jnp.transpose(x, (1, 0, 2)).reshape(C, N * seg_len)


def unfold_lanes_to_ncl(x2d, n_batch, valid_len, seg_len):
    """(C, N*seg_len) -> (N, C, valid_len)."""
    C = x2d.shape[0]
    x = x2d.reshape(C, n_batch, seg_len).transpose(1, 0, 2)
    return x if seg_len == valid_len else x[:, :, :valid_len]


def _vmem_budget_bytes():
    """Generation-aware VMEM budget (v7x: 64 MiB/TC, v5e/v6e: 128 MiB)."""
    cap = None
    try:
        cap = getattr(pltpu.get_tpu_info(), "vmem_capacity_bytes", None)
    except Exception:
        cap = None
    if not cap:
        cap = 64 << 20          # conservative fallback (v7x per-core VMEM)
    return min(int(cap) * 3 // 4, 56 << 20)


# ---------------------------------------------------------------------------
# Folded-layout entry point (interchange format between chained BaseConv blocks)
# ---------------------------------------------------------------------------

def base_conv_forward_folded(x2d, params, *, n_batch, valid_len, seg_len,
                             out_dtype=None, target_lanes=16384):
    """Run one BaseConv block on a folded (C, N*seg_len) slab, return same layout."""
    w1s, t1, w2s, t2 = params
    C_in = x2d.shape[0]
    C_mid = w1s.shape[1]
    C_out = w2s.shape[1]
    assert C_out == C_in, "residual add requires in_feature == out_feature"
    N, Lp, L = n_batch, seg_len, valid_len
    assert Lp % 128 == 0 and L <= Lp
    assert x2d.shape == (C_in, N * Lp)

    out_dtype = x2d.dtype if out_dtype is None else out_dtype
    dot_dtype = w1s.dtype
    in_b = jnp.dtype(x2d.dtype).itemsize
    out_b = jnp.dtype(out_dtype).itemsize
    dot_b = jnp.dtype(dot_dtype).itemsize

    # VMEM bytes per lane: f32 temporaries (x, y, z) + dot_dtype tap copies +
    # double-buffered in/out blocks (BlockSpec pipeline).
    temp_bpl = 4 * (C_in + C_mid + C_out) + 2 * dot_b * (C_in + C_mid)
    io_bpl = 2 * (C_in * in_b + C_out * out_b)
    bpl = temp_bpl + io_bpl

    # --- batch-tile (slab) selection -------------------------------------
    vmem_budget = _vmem_budget_bytes()
    max_bt_vmem = max(1, int(vmem_budget // (bpl * Lp)))
    bt = max(1, min(N, max(1, target_lanes // Lp), max_bt_vmem))
    while N % bt:
        bt -= 1
    # For large problems keep >= 4 grid steps (pipeline overlap / both v7x
    # TensorCores), but never shrink a step below ~1 MiB of HBM I/O.  Small
    # problems stay in a single big step (single-TC v5e/v6e: splitting is
    # pure per-step overhead).
    io_per_sample = Lp * (C_in * in_b + C_out * out_b)
    min_bt = max(1, -(-(1 << 20) // io_per_sample))
    if N // bt < 4:
        for cand in range(bt - 1, 0, -1):
            if N % cand == 0 and N // cand >= 4 and cand >= min_bt:
                bt = cand
                break
    T = bt * Lp
    grid = (N // bt,)

    # Precomputed lane position within each segment (hoists iota/mod out of
    # the hot path; constant index_map -> fetched once, stays resident).
    pos = (jnp.arange(T, dtype=jnp.int32) % Lp).reshape(1, T)

    param_bytes = (w1s.size + w2s.size) * dot_b + (t1.size + t2.size) * 4 + T * 4
    vmem_need = T * bpl + param_bytes
    vmem_limit = int(max(min(2 * vmem_need, vmem_budget),
                         vmem_need + (2 << 20), 16 << 20))

    cost = pl.CostEstimate(
        flops=2 * N * Lp * 3 * (C_in * C_mid + C_mid * C_out),
        transcendentals=0,
        bytes_accessed=N * Lp * (C_in * in_b + C_out * out_b) + param_bytes)

    kernel = functools.partial(baseconv_kernel, seg_len=Lp, valid_len=L,
                               dot_dtype=dot_dtype)
    full = lambda shape: pl.BlockSpec(shape, lambda i: (0,) * len(shape))

    return pl.pallas_call(
        kernel,
        out_shape=jax.ShapeDtypeStruct((C_out, N * Lp), out_dtype),
        grid_spec=pltpu.PrefetchScalarGridSpec(
            num_scalar_prefetch=0,
            grid=grid,
            in_specs=[
                pl.BlockSpec((1, T), lambda i: (0, 0)),       # lane positions (resident)
                pl.BlockSpec((C_in, T), lambda i: (0, i)),    # x slab
                full((3, C_mid, C_in)),                       # folded conv1 weights
                full((C_mid, 1)),                             # folded conv1 shift
                full((3, C_out, C_mid)),                      # folded conv2 weights
                full((C_out, 1)),                             # folded conv2 shift
            ],
            out_specs=pl.BlockSpec((C_out, T), lambda i: (0, i)),
        ),
        compiler_params=pltpu.CompilerParams(
            dimension_semantics=("parallel",),
            vmem_limit_bytes=vmem_limit),
        cost_estimate=cost,
    )(pos, x2d, w1s, t1, w2s, t2)


# ---------------------------------------------------------------------------
# Convenience NCL entry point (folds / unfolds around the kernel)
# ---------------------------------------------------------------------------

def base_conv_forward(x0, w1, b1, bn1, w2, b2, bn2, eps=1e-5, *,
                      use_bf16=False, target_lanes=16384):
    """x0: (N, C_in, L).  wX: (C_out, C_in, 3) PyTorch Conv1d layout.
    bnX = (gamma, beta, running_mean, running_var) -- eval-mode BatchNorm.
    use_bf16: bf16 MXU operands AND bf16 HBM activations for the kernel
    (recommended on v5e); residual / BN shift / ReLU stay f32 in-kernel."""
    N, C_in, L = x0.shape
    Lp = _lane_pad(L)
    dot_dtype = jnp.bfloat16 if use_bf16 else jnp.float32

    params = fold_base_conv_params(w1, b1, bn1, w2, b2, bn2, eps,
                                   dot_dtype=dot_dtype)
    x2d = fold_ncl_to_lanes(x0, Lp)
    if use_bf16:
        x2d = x2d.astype(jnp.bfloat16)      # halve kernel HBM read traffic

    out2d = base_conv_forward_folded(
        x2d, params, n_batch=N, valid_len=L, seg_len=Lp,
        out_dtype=(jnp.bfloat16 if use_bf16 else x0.dtype),
        target_lanes=target_lanes)

    return unfold_lanes_to_ncl(out2d, N, L, Lp).astype(x0.dtype)


# ---------------------------------------------------------------------------
# Pure-JAX reference (matches PyTorch eval-mode forward)
# ---------------------------------------------------------------------------

def base_conv_reference(x0, w1, b1, bn1, w2, b2, bn2, eps=1e-5):
    def conv1d(x, w, b):
        y = lax.conv_general_dilated(
            x, w, window_strides=(1,), padding=((1, 1),),
            dimension_numbers=("NCH", "OIH", "NCH"))
        return y + b.reshape(1, -1, 1)

    def bn(x, p):
        gamma, beta, mean, var = p
        return (x - mean.reshape(1, -1, 1)) / jnp.sqrt(var.reshape(1, -1, 1) + eps) \
               * gamma.reshape(1, -1, 1) + beta.reshape(1, -1, 1)

    x1 = jax.nn.relu(bn(conv1d(x0, w1, b1), bn1))
    return jax.nn.relu(x0 + bn(conv1d(x1, w2, b2), bn2))


if __name__ == "__main__":
    # Small deterministic shapes: batch=4, in_feature=out_feature=16,
    # mid_feature=32, sequence length L=128.
    N, C_in, C_mid, C_out, L = 4, 16, 32, 16, 128

    key = jax.random.PRNGKey(0)
    keys = jax.random.split(key, 13)

    x0 = jax.random.normal(keys[0], (N, C_in, L), jnp.float32)

    # Conv parameters (PyTorch Conv1d layout: (C_out, C_in, K))
    w1 = 0.1 * jax.random.normal(keys[1], (C_mid, C_in, 3), jnp.float32)
    b1 = 0.1 * jax.random.normal(keys[2], (C_mid,), jnp.float32)
    w2 = 0.1 * jax.random.normal(keys[3], (C_out, C_mid, 3), jnp.float32)
    b2 = 0.1 * jax.random.normal(keys[4], (C_out,), jnp.float32)

    # BatchNorm1d params (eval mode, deterministic non-trivial values)
    bn1 = (1.0 + 0.1 * jax.random.normal(keys[5], (C_mid,), jnp.float32),   # gamma
           0.1 * jax.random.normal(keys[6], (C_mid,), jnp.float32),          # beta
           0.1 * jax.random.normal(keys[7], (C_mid,), jnp.float32),          # running_mean
           1.0 + 0.1 * jnp.abs(jax.random.normal(keys[8], (C_mid,), jnp.float32)))  # running_var
    bn2 = (1.0 + 0.1 * jax.random.normal(keys[9], (C_out,), jnp.float32),
           0.1 * jax.random.normal(keys[10], (C_out,), jnp.float32),
           0.1 * jax.random.normal(keys[11], (C_out,), jnp.float32),
           1.0 + 0.1 * jnp.abs(jax.random.normal(keys[12], (C_out,), jnp.float32)))

    ref = jax.block_until_ready(base_conv_reference(x0, w1, b1, bn1, w2, b2, bn2))

    # f32 MXU path (tight tolerance).
    out_f32 = jax.block_until_ready(
        base_conv_forward(x0, w1, b1, bn1, w2, b2, bn2, use_bf16=False))
    assert out_f32.shape == (N, C_out, L)
    assert jnp.allclose(out_f32, ref, atol=1e-4, rtol=1e-4), \
        f"f32 max abs err {jnp.max(jnp.abs(out_f32 - ref))}"

    # bf16 HBM-activation + bf16-MXU path (residual / BN shift / ReLU in f32).
    out_bf16 = jax.block_until_ready(
        base_conv_forward(x0, w1, b1, bn1, w2, b2, bn2, use_bf16=True))
    assert jnp.allclose(out_bf16, ref, atol=5e-2, rtol=5e-2), \
        f"bf16 max abs err {jnp.max(jnp.abs(out_bf16 - ref))}"

    # Non-lane-aligned L: wrapper pads L to 128 (lane-dense stores) and slices back.
    L2 = 96
    x0b = jax.random.normal(keys[0], (2, C_in, L2), jnp.float32)
    refb = jax.block_until_ready(base_conv_reference(x0b, w1, b1, bn1, w2, b2, bn2))
    outb = jax.block_until_ready(
        base_conv_forward(x0b, w1, b1, bn1, w2, b2, bn2, use_bf16=False))
    assert outb.shape == (2, C_out, L2)
    assert jnp.allclose(outb, refb, atol=1e-4, rtol=1e-4), \
        f"padded-L max abs err {jnp.max(jnp.abs(outb - refb))}"

    # Chained blocks in the folded (C, N*Lp) interchange layout: no wrapper
    # pad/transpose round trips between blocks; kernel re-zeroes padded lanes.
    Lp2 = _lane_pad(L2)
    params32 = fold_base_conv_params(w1, b1, bn1, w2, b2, bn2, dot_dtype=jnp.float32)
    h = fold_ncl_to_lanes(x0b, Lp2)
    h = base_conv_forward_folded(h, params32, n_batch=2, valid_len=L2, seg_len=Lp2)
    h = base_conv_forward_folded(h, params32, n_batch=2, valid_len=L2, seg_len=Lp2)
    out_chain = jax.block_until_ready(unfold_lanes_to_ncl(h, 2, L2, Lp2))
    ref_chain = jax.block_until_ready(
        base_conv_reference(refb, w1, b1, bn1, w2, b2, bn2))
    assert jnp.allclose(out_chain, ref_chain, atol=1e-3, rtol=1e-3), \
        f"chained max abs err {jnp.max(jnp.abs(out_chain - ref_chain))}"

    print("KERNEL_OK")
</pallas_src>

<mosaic_0001>
module attributes {stable_mosaic.version = 11 : i64} {
  func.func @baseconv_kernel(%arg0: i32, %arg1: memref<1x512xi32, #tpu.memory_space<vmem>>, %arg2: memref<16x512xf32, #tpu.memory_space<vmem>>, %arg3: memref<3x32x16xf32, #tpu.memory_space<vmem>>, %arg4: memref<32x1xf32, #tpu.memory_space<vmem>>, %arg5: memref<3x16x32xf32, #tpu.memory_space<vmem>>, %arg6: memref<16x1xf32, #tpu.memory_space<vmem>>, %arg7: memref<16x512xf32, #tpu.memory_space<vmem>>) attributes {dimension_semantics = [#tpu.dimension_semantics<parallel>], iteration_bounds = array<i64: 1>, scalar_prefetch = 0 : i64, scratch_operands = 0 : i64, tpu.core_type = #tpu.core_type<tc>, window_params = [{pipeline_mode = #tpu.pipeline_mode<synchronous>, transform_indices = @transform_0, window_bounds = array<i64: 1, 512>}, {transform_indices = @transform_1, window_bounds = array<i64: 16, 512>}, {pipeline_mode = #tpu.pipeline_mode<synchronous>, transform_indices = @transform_2, window_bounds = array<i64: 3, 32, 16>}, {pipeline_mode = #tpu.pipeline_mode<synchronous>, transform_indices = @transform_3, window_bounds = array<i64: 32, 1>}, {pipeline_mode = #tpu.pipeline_mode<synchronous>, transform_indices = @transform_4, window_bounds = array<i64: 3, 16, 32>}, {pipeline_mode = #tpu.pipeline_mode<synchronous>, transform_indices = @transform_5, window_bounds = array<i64: 16, 1>}, {transform_indices = @transform_6, window_bounds = array<i64: 16, 512>}]} {
    %c0 = arith.constant 0 : index
    %c0_0 = arith.constant 0 : index
    %0 = vector.load %arg2[%c0, %c0_0] : memref<16x512xf32, #tpu.memory_space<vmem>>, vector<16x512xf32>
    %c0_1 = arith.constant 0 : index
    %c0_2 = arith.constant 0 : index
    %1 = vector.load %arg1[%c0_1, %c0_2] : memref<1x512xi32, #tpu.memory_space<vmem>>, vector<1x512xi32>
    %c0_i32 = arith.constant 0 : i32
    %2 = vector.broadcast %c0_i32 : i32 to vector<1x512xi32>
    %3 = arith.cmpi ne, %1, %2 : vector<1x512xi32>
    %c127_i32 = arith.constant 127 : i32
    %4 = vector.broadcast %c127_i32 : i32 to vector<1x512xi32>
    %5 = arith.cmpi slt, %1, %4 : vector<1x512xi32>
    %c1_i32 = arith.constant 1 : i32
    %6 = tpu.dynamic_rotate %0 by %c1_i32 dim 1 : vector<16x512xf32>, i32 -> vector<16x512xf32>
    %cst = arith.constant 0.000000e+00 : f32
    %7 = vector.shape_cast %3 : vector<1x512xi1> to vector<1x512xi1>
    %8 = vector.broadcast %7 : vector<1x512xi1> to vector<16x512xi1>
    %9 = vector.broadcast %cst : f32 to vector<16x512xf32>
    %10 = arith.select %8, %6, %9 : vector<16x512xi1>, vector<16x512xf32>
    %c511_i32 = arith.constant 511 : i32
    %11 = tpu.dynamic_rotate %0 by %c511_i32 dim 1 : vector<16x512xf32>, i32 -> vector<16x512xf32>
    %cst_3 = arith.constant 0.000000e+00 : f32
    %12 = vector.shape_cast %5 : vector<1x512xi1> to vector<1x512xi1>
    %13 = vector.broadcast %12 : vector<1x512xi1> to vector<16x512xi1>
    %14 = vector.broadcast %cst_3 : f32 to vector<16x512xf32>
    %15 = arith.select %13, %11, %14 : vector<16x512xi1>, vector<16x512xf32>
    %c0_4 = arith.constant 0 : index
    %c0_5 = arith.constant 0 : index
    %c0_6 = arith.constant 0 : index
    %16 = vector.load %arg3[%c0_4, %c0_5, %c0_6] : memref<3x32x16xf32, #tpu.memory_space<vmem>>, vector<3x32x16xf32>
    %17 = vector.extract_strided_slice %16 {offsets = [0, 0, 0], sizes = [1, 32, 16], strides = [1, 1, 1]} : vector<3x32x16xf32> to vector<1x32x16xf32>
    %18 = vector.shape_cast %17 : vector<1x32x16xf32> to vector<32x16xf32>
    %cst_7 = arith.constant dense<0.000000e+00> : vector<32x512xf32>
    %19 = tpu.matmul %18, %10, %cst_7 {dimension_numbers = #tpu.dot_dimension_numbers<[1], [0], [0], [1], [0, 0, 1, 1], [], []>} : vector<32x16xf32>, vector<16x512xf32>, vector<32x512xf32> -> vector<32x512xf32>
    %20 = vector.extract_strided_slice %16 {offsets = [1, 0, 0], sizes = [1, 32, 16], strides = [1, 1, 1]} : vector<3x32x16xf32> to vector<1x32x16xf32>
    %21 = vector.shape_cast %20 : vector<1x32x16xf32> to vector<32x16xf32>
    %cst_8 = arith.constant dense<0.000000e+00> : vector<32x512xf32>
    %22 = tpu.matmul %21, %0, %cst_8 {dimension_numbers = #tpu.dot_dimension_numbers<[1], [0], [0], [1], [0, 0, 1, 1], [], []>} : vector<32x16xf32>, vector<16x512xf32>, vector<32x512xf32> -> vector<32x512xf32>
    %23 = arith.addf %19, %22 : vector<32x512xf32>
    %24 = vector.extract_strided_slice %16 {offsets = [2, 0, 0], sizes = [1, 32, 16], strides = [1, 1, 1]} : vector<3x32x16xf32> to vector<1x32x16xf32>
    %25 = vector.shape_cast %24 : vector<1x32x16xf32> to vector<32x16xf32>
    %cst_9 = arith.constant dense<0.000000e+00> : vector<32x512xf32>
    %26 = tpu.matmul %25, %15, %cst_9 {dimension_numbers = #tpu.dot_dimension_numbers<[1], [0], [0], [1], [0, 0, 1, 1], [], []>} : vector<32x16xf32>, vector<16x512xf32>, vector<32x512xf32> -> vector<32x512xf32>
    %27 = arith.addf %23, %26 : vector<32x512xf32>
    %c0_10 = arith.constant 0 : index
    %c0_11 = arith.constant 0 : index
    %28 = vector.load %arg4[%c0_10, %c0_11] : memref<32x1xf32, #tpu.memory_space<vmem>>, vector<32x1xf32>
    %29 = vector.broadcast %28 : vector<32x1xf32> to vector<32x512xf32>
    %30 = arith.addf %27, %29 : vector<32x512xf32>
    %cst_12 = arith.constant 0.000000e+00 : f32
    %31 = vector.broadcast %cst_12 : f32 to vector<32x512xf32>
    %32 = arith.maximumf %30, %31 : vector<32x512xf32>
    %c1_i32_13 = arith.constant 1 : i32
    %33 = tpu.dynamic_rotate %32 by %c1_i32_13 dim 1 : vector<32x512xf32>, i32 -> vector<32x512xf32>
    %cst_14 = arith.constant 0.000000e+00 : f32
    %34 = vector.shape_cast %3 : vector<1x512xi1> to vector<1x512xi1>
    %35 = vector.broadcast %34 : vector<1x512xi1> to vector<32x512xi1>
    %36 = vector.broadcast %cst_14 : f32 to vector<32x512xf32>
    %37 = arith.select %35, %33, %36 : vector<32x512xi1>, vector<32x512xf32>
    %c511_i32_15 = arith.constant 511 : i32
    %38 = tpu.dynamic_rotate %32 by %c511_i32_15 dim 1 : vector<32x512xf32>, i32 -> vector<32x512xf32>
    %cst_16 = arith.constant 0.000000e+00 : f32
    %39 = vector.shape_cast %5 : vector<1x512xi1> to vector<1x512xi1>
    %40 = vector.broadcast %39 : vector<1x512xi1> to vector<32x512xi1>
    %41 = vector.broadcast %cst_16 : f32 to vector<32x512xf32>
    %42 = arith.select %40, %38, %41 : vector<32x512xi1>, vector<32x512xf32>
    %c0_17 = arith.constant 0 : index
    %c0_18 = arith.constant 0 : index
    %c0_19 = arith.constant 0 : index
    %43 = vector.load %arg5[%c0_17, %c0_18, %c0_19] : memref<3x16x32xf32, #tpu.memory_space<vmem>>, vector<3x16x32xf32>
    %44 = vector.extract_strided_slice %43 {offsets = [0, 0, 0], sizes = [1, 16, 32], strides = [1, 1, 1]} : vector<3x16x32xf32> to vector<1x16x32xf32>
    %45 = vector.shape_cast %44 : vector<1x16x32xf32> to vector<16x32xf32>
    %cst_20 = arith.constant dense<0.000000e+00> : vector<16x512xf32>
    %46 = tpu.matmul %45, %37, %cst_20 {dimension_numbers = #tpu.dot_dimension_numbers<[1], [0], [0], [1], [0, 0, 1, 1], [], []>} : vector<16x32xf32>, vector<32x512xf32>, vector<16x512xf32> -> vector<16x512xf32>
    %47 = vector.extract_strided_slice %43 {offsets = [1, 0, 0], sizes = [1, 16, 32], strides = [1, 1, 1]} : vector<3x16x32xf32> to vector<1x16x32xf32>
    %48 = vector.shape_cast %47 : vector<1x16x32xf32> to vector<16x32xf32>
    %cst_21 = arith.constant dense<0.000000e+00> : vector<16x512xf32>
    %49 = tpu.matmul %48, %32, %cst_21 {dimension_numbers = #tpu.dot_dimension_numbers<[1], [0], [0], [1], [0, 0, 1, 1], [], []>} : vector<16x32xf32>, vector<32x512xf32>, vector<16x512xf32> -> vector<16x512xf32>
    %50 = arith.addf %46, %49 : vector<16x512xf32>
    %51 = vector.extract_strided_slice %43 {offsets = [2, 0, 0], sizes = [1, 16, 32], strides = [1, 1, 1]} : vector<3x16x32xf32> to vector<1x16x32xf32>
    %52 = vector.shape_cast %51 : vector<1x16x32xf32> to vector<16x32xf32>
    %cst_22 = arith.constant dense<0.000000e+00> : vector<16x512xf32>
    %53 = tpu.matmul %52, %42, %cst_22 {dimension_numbers = #tpu.dot_dimension_numbers<[1], [0], [0], [1], [0, 0, 1, 1], [], []>} : vector<16x32xf32>, vector<32x512xf32>, vector<16x512xf32> -> vector<16x512xf32>
    %54 = arith.addf %50, %53 : vector<16x512xf32>
    %c0_23 = arith.constant 0 : index
    %c0_24 = arith.constant 0 : index
    %55 = vector.load %arg6[%c0_23, %c0_24] : memref<16x1xf32, #tpu.memory_space<vmem>>, vector<16x1xf32>
    %56 = vector.broadcast %55 : vector<16x1xf32> to vector<16x512xf32>
    %57 = arith.addf %54, %56 : vector<16x512xf32>
    %58 = arith.addf %0, %57 : vector<16x512xf32>
    %cst_25 = arith.constant 0.000000e+00 : f32
    %59 = vector.broadcast %cst_25 : f32 to vector<16x512xf32>
    %60 = arith.maximumf %58, %59 : vector<16x512xf32>
    %c0_26 = arith.constant 0 : index
    %c0_27 = arith.constant 0 : index
    %61 = vector.load %arg7[%c0_26, %c0_27] : memref<16x512xf32, #tpu.memory_space<vmem>>, vector<16x512xf32>
    tpu.vector_store %arg7[%c0_26, %c0_27], %60 {strides = array<i32>} : memref<16x512xf32, #tpu.memory_space<vmem>>, vector<16x512xf32>,
    return
  }
  func.func @transform_0(%arg0: i32) -> (i32, i32) {
    %c0_i32 = arith.constant 0 : i32
    %c0_i32_0 = arith.constant 0 : i32
    %c0_i32_1 = arith.constant 0 : i32
    return %c0_i32, %c0_i32_0 : i32, i32
  }
  func.func @transform_1(%arg0: i32) -> (i32, i32) {
    %c0_i32 = arith.constant 0 : i32
    %c0_i32_0 = arith.constant 0 : i32
    return %c0_i32, %arg0 : i32, i32
  }
  func.func @transform_2(%arg0: i32) -> (i32, i32, i32) {
    %c0_i32 = arith.constant 0 : i32
    %c0_i32_0 = arith.constant 0 : i32
    %c0_i32_1 = arith.constant 0 : i32
    %c0_i32_2 = arith.constant 0 : i32
    return %c0_i32, %c0_i32_0, %c0_i32_1 : i32, i32, i32
  }
  func.func @transform_3(%arg0: i32) -> (i32, i32) {
    %c0_i32 = arith.constant 0 : i32
    %c0_i32_0 = arith.constant 0 : i32
    %c0_i32_1 = arith.constant 0 : i32
    return %c0_i32, %c0_i32_0 : i32, i32
  }
  func.func @transform_4(%arg0: i32) -> (i32, i32, i32) {
    %c0_i32 = arith.constant 0 : i32
    %c0_i32_0 = arith.constant 0 : i32
    %c0_i32_1 = arith.constant 0 : i32
    %c0_i32_2 = arith.constant 0 : i32
    return %c0_i32, %c0_i32_0, %c0_i32_1 : i32, i32, i32
  }
  func.func @transform_5(%arg0: i32) -> (i32, i32) {
    %c0_i32 = arith.constant 0 : i32
    %c0_i32_0 = arith.constant 0 : i32
    %c0_i32_1 = arith.constant 0 : i32
    return %c0_i32, %c0_i32_0 : i32, i32
  }
  func.func @transform_6(%arg0: i32) -> (i32, i32) {
    %c0_i32 = arith.constant 0 : i32
    %c0_i32_0 = arith.constant 0 : i32
    return %c0_i32, %arg0 : i32, i32
  }
}

</mosaic_0001>

<bundles_post_ra>
// kernel: tpu_custom_call.1
= control target key start
LH: loop header
LB: loop body
LE: loop exit
PB: predicated region body
PF: predicated region fallthrough
CT: control target
= control target key end

     0   :  { %s1248_s25 = smov 1   ;;  %s1887_s0 = inlined_call_operand.vmem [shape: s32[1,512], index: 0, kind: input, shape index: {}]   ;;  %s1888_s1 = inlined_call_operand.vmem [shape: f32[16,512], index: 1, kind: input, shape index: {}]   ;;  %s1889_s2 = inlined_call_operand.vmem [shape: f32[3,32,16], index: 2, kind: input, shape index: {}]   ;;  %s1890_s3 = inlined_call_operand.vmem [shape: f32[32,1], index: 3, kind: input, shape index: {}]   ;;  %s1891_s4 = inlined_call_operand.vmem [shape: f32[3,16,32], index: 4, kind: input, shape index: {}]   ;;  %s1892_s5 = inlined_call_operand.vmem [shape: f32[16,1], index: 5, kind: input, shape index: {}]   ;;  %s1893_s6 = inlined_call_operand.hbm [shape: f32[16,512], index: 6, kind: output, shape index: {}]  }
   0x1   :  { %v29_v0 = vld [vmem:[%s1888_s1 + $0x28] sm:$0xff]  ;;  %v31_v1 = vld [vmem:[%s1888_s1 + $0x38] sm:$0xff]  ;;  %v30_v2 = vld [vmem:[%s1888_s1 + $0x30] sm:$0xff] }
   0x2   :  { %41 = vrot.lane.b32.xlu0 %v29_v0, %s1248_s25  ;;  %49 = vrot.lane.b32.xlu1 %v31_v1, %s1248_s25  ;;  %v28_v3 = vld [vmem:[%s1888_s1 + $0x20] sm:$0xff]  ;;  %v1306_v4 = vld [vmem:[%s1888_s1 + $0x10] sm:$0xff] }
   0x3   :  { %218 = vmatpush.msra.mxu2 %v30_v2  ;;  %247 = vmatpush.msra.mxu3 %v31_v1  ;;  %v1313_v5 = vld [vmem:[%s1888_s1 + $0x18] sm:$0xff] }
   0x4   :  { %43 = vrot.lane.b32.xlu2 %v1306_v4, %s1248_s25  ;;  %160 = vmatpush.msra.mxu0 %v28_v3 }
   0x5   :  { %11 = vsyncpa [#allocation3], 0  ;;  %v1318_v6 = vld [vmem:[%s1888_s1] sm:$0xff]  ;;  %219 = vmatpush.msra.mxu2 %v1306_v4  ;;  %248 = vmatpush.msra.mxu3 %v1313_v5  ;;  %v1326_v7 = vld [vmem:[%s1888_s1 + $0x8] sm:$0xff]  ;;  %vm133_vm0 = vcmask 130048   ;;  %s1249_s18 = smov 127   ;;  %v51_v17 = vlaneseq }
   0x6   :  { %189 = vmatpush.msra.mxu1 %v29_v0  ;;  %161 = vmatpush.msra.mxu0 %v1318_v6  ;;  %v125_v8 = vld [vmem:[%s1889_s2 + $0x20] sm:$0xff]  ;;  %v126_v9 = vld [vmem:[%s1889_s2 + $0x28] sm:$0xff]  ;;  %v127_v10 = vld [vmem:[%s1889_s2 + $0x30] sm:$0xff]  ;;  %v1250_v12 = vmov 0   ;;  %vm724_vm13 = vcmask 261120   ;;  %s1251_s21 = smov [#allocation2]  }
   0x7   :  { %1097 = vmatmul.msk.f32.vlgmr.msra.gmra.mxu2 %vm133_vm0, %v125_v8  ;;  %1101 = vmatmul.msk.f32.vlgmr.msra.gmra.mxu3 %vm133_vm0, %v125_v8  ;;  %v128_v11 = vld [vmem:[%s1889_s2 + $0x38] sm:$0xff]  ;;  %v32_v15 = vld [vmem:[%s1887_s0] sm:$0xf]  ;;  %v1382_v21 = vand.u32 127, %v51_v17  ;;  %v122_v48 = vld [vmem:[%s1889_s2 + $0x8] sm:$0xff]  ;;  %s1075_s22 = sshll.u32 %s1251_s21, 4  ;;  %s1076_s22 = int_to_ptr.vmem [resolvable:$true] %s1075_s22 }
   0x8   :  { %190 = vmatpush.msra.mxu1 %v1326_v7  ;;  %1089 = vmatmul.msk.f32.vlgmr.msra.gmra.mxu0 %vm133_vm0, %v125_v8  ;;  %vm33_vm1 = vcmp.ne.s32.totalorder %v32_v15, 0  ;;  %v121_v33 = vld [vmem:[%s1889_s2] sm:$0xff]  ;;  %vm34_vm5 = vcmp.lt.s32.totalorder %v32_v15, 127  ;;  %v537_v46 = vld [vmem:[%s1890_s3 + $0x18] sm:$0xff]  ;;  %v123_v63 = vld [vmem:[%s1889_s2 + $0x10] sm:$0xff]  ;;  %s1077_s24 = sshll.u32 %s1893_s6, 4  ;;  %s1078_s24 = int_to_ptr.hbm [resolvable:$true] %s1077_s24 }
   0x9   :  { %1093 = vmatmul.msk.f32.vlgmr.msra.gmra.mxu1 %vm133_vm0, %v125_v8  ;;  %1215 = vset.pattern.permute.xlu1 %v1250_v12  ;;  %v62_v20 = vsel %vm33_vm1, 1, %v1250_v12  ;;  %vm53_vm2 = vcmp.lt.s32.totalorder %v1382_v21, 1  ;;  %v104_v36 = vsel %vm34_vm5, 1, %v1250_v12  ;;  %vm95_vm8 = vcmp.lt.s32.totalorder %v1382_v21, 127  ;;  %v534_v62 = vld [vmem:[%s1890_s3] sm:$0xff]  ;;  %v124_v8 = vld [vmem:[%s1889_s2 + $0x18] sm:$0xff] }
   0xa   :  { %45 = vrot.lane.b32.xlu0 %v30_v2, %s1248_s25  ;;  %39 = vrot.lane.b32.xlu1 %v1326_v7, %s1248_s25  ;;  %v65_v22 = vperm.slane %v62_v20, 2  ;;  %v66_v23 = vperm.slane %v62_v20, 3  ;;  %v64_v34 = vperm.slane %v62_v20, 1  ;;  %v63_v35 = vperm.slane %v62_v20, 0  ;;  %v130_v15 = vld [vmem:[%s1889_s2 + $0x48] sm:$0xff]  ;;  %v132_v17 = vld [vmem:[%s1889_s2 + $0x58] sm:$0xff] }
   0xb   :  { %1217 = vset.pattern.permute.xlu0 %v1250_v12  ;;  %1216 = vset.pattern.permute.xlu2 %v1250_v12  ;;  %v105_v41 = vperm.slane %v104_v36, 0  ;;  %v108_v49 = vperm.slane %v104_v36, 3  ;;  %v107_v50 = vperm.slane %v104_v36, 2  ;;  %v106_v53 = vperm.slane %v104_v36, 1  ;;  %v723_v54 = vld [vmem:[%s1891_s4 + $0x28] sm:$0xff] }
   0xc   :  { %47 = vrot.lane.b32.xlu2 %v1313_v5, %s1248_s25  ;;  %vm1385_vm3 = vcmp.eq.s32.totalorder %v65_v22, 1  ;;  %vm1389_vm4 = vcmp.eq.s32.totalorder %v66_v23, 1  ;;  %vm1416_vm6 = vcmp.eq.s32.totalorder %v64_v34, 1  ;;  %vm1420_vm7 = vcmp.eq.s32.totalorder %v63_v35, 1 }
   0xd   :  { %vm1450_vm9 = vcmp.eq.s32.totalorder %v105_v41, 1  ;;  %vm1460_vm10 = vcmp.eq.s32.totalorder %v108_v49, 1  ;;  %vm1464_vm11 = vcmp.eq.s32.totalorder %v107_v50, 1  ;;  %vm1468_vm12 = vcmp.eq.s32.totalorder %v106_v53, 1 }
   0xf   :  { %1098 = vmatmul.msk.f32.gmra.mxu2 %vm133_vm0, %v126_v9  ;;  %1102 = vmatmul.msk.f32.gmra.mxu3 %vm133_vm0, %v126_v9 }
  0x10   :  { %1090 = vmatmul.msk.f32.gmra.mxu0 %vm133_vm0, %v126_v9 }
  0x11   :  { %1094 = vmatmul.msk.f32.gmra.mxu1 %vm133_vm0, %v126_v9  ;;  %v535_v9 = vld [vmem:[%s1890_s3 + $0x8] sm:$0xff] }
  0x12   :  { %37 = vrot.lane.b32.xlu0 %v28_v3, %s1248_s25  ;;  %35 = vrot.lane.b32.xlu1 %v1318_v6, %s1248_s25 }
  0x14   :  { %81 = vrot.lane.b32.xlu2 %v28_v3, %s1249_s18 }
  0x17   :  { %1099 = vmatmul.msk.f32.gmra.mxu2 %vm133_vm0, %v127_v10  ;;  %1103 = vmatmul.msk.f32.gmra.mxu3 %vm133_vm0, %v127_v10 }
  0x18   :  { %1091 = vmatmul.msk.f32.gmra.mxu0 %vm133_vm0, %v127_v10 }
  0x19   :  { %1095 = vmatmul.msk.f32.gmra.mxu1 %vm133_vm0, %v127_v10 }
  0x1a   :  { %89 = vrot.lane.b32.xlu0 %v30_v2, %s1249_s18  ;;  %93 = vrot.lane.b32.xlu1 %v31_v1, %s1249_s18 }
  0x1c   :  { %79 = vrot.lane.b32.xlu2 %v1318_v6, %s1249_s18 }
  0x1f   :  { %1100 = vmatmul.msk.f32.gmra.mxu2 %vm133_vm0, %v128_v11  ;;  %1104 = vmatmul.msk.f32.gmra.mxu3 %vm133_vm0, %v128_v11 }
  0x20   :  { %1092 = vmatmul.msk.f32.gmra.mxu0 %vm133_vm0, %v128_v11 }
  0x21   :  { %1096 = vmatmul.msk.f32.gmra.mxu1 %vm133_vm0, %v128_v11 }
  0x22   :  { %87 = vrot.lane.b32.xlu0 %v1306_v4, %s1249_s18  ;;  %91 = vrot.lane.b32.xlu1 %v1313_v5, %s1249_s18 }
  0x24   :  { %85 = vrot.lane.b32.xlu2 %v29_v0, %s1249_s18 }
  0x2a   :  { %83 = vrot.lane.b32.xlu0 %v1326_v7, %s1249_s18  ;;  %555 = vperm.xlu1 %1215, %v537_v46  }
  0x32   :  { %540 = vperm.xlu1 %1215, %v534_v62   ;;  %545 = vperm.xlu0 %1217, %v535_v9  }
  0x5e   :  { %v44_v13 = vpop.permute.xlu2 %43 }
  0x66   :  { %v48_v14 = vpop.permute.xlu2 %47 }
  0x67   :  { %v54_v32 = vsel %vm53_vm2, %v44_v13, %v48_v14 }
  0x6e   :  { %v1380_v16 = vpop.permute.xlu2 %81 }
  0x74   :  { %v42_v18 = vpop.permute.xlu0 %41  ;;  %v50_v19 = vpop.permute.xlu1 %49 }
  0x76   :  { %v1393_v26 = vpop.permute.xlu2 %79 }
  0x7c   :  { %v46_v27 = vpop.permute.xlu0 %45  ;;  %v40_v28 = vpop.permute.xlu1 %39 }
  0x7d   :  { %v57_v29 = vsel %vm53_vm2, %v42_v18, %v46_v27  ;;  %v55_v30 = vsel %vm53_vm2, %v46_v27, %v50_v19  ;;  %v56_v31 = vsel %vm53_vm2, %v40_v28, %v44_v13  ;;  %v129_v13 = vld [vmem:[%s1889_s2 + $0x40] sm:$0xff] }
  0x7e   :  { %1117 = vmatpush.msk.msrb.mxu2 %vm1385_vm3, %v57_v29  ;;  %1123 = vmatpush.msk.msrb.mxu3 %vm1389_vm4, %v55_v30  ;;  %v86_v45 = vpop.permute.xlu2 %85 }
  0x7f   :  { %v101_v51 = vsel %vm95_vm8, %v1380_v16, %v86_v45 }
  0x80   :  { %1118 = vmatpush.msk.msrb.mxu2 %vm1385_vm3, %v56_v31  ;;  %1124 = vmatpush.msk.msrb.mxu3 %vm1389_vm4, %v54_v32 }
  0x81   :  { %1119 = vmatmul.msk.f32.vlgmr.msrb.gmra.mxu2 %vm133_vm0, %v121_v33  ;;  %1125 = vmatmul.msk.f32.vlgmr.msrb.gmra.mxu3 %vm133_vm0, %v121_v33 }
  0x84   :  { %v38_v39 = vpop.permute.xlu0 %37  ;;  %v36_v40 = vpop.permute.xlu1 %35 }
  0x85   :  { %v59_v42 = vsel %vm53_vm2, %v38_v39, %v42_v18  ;;  %v61_v43 = vsel %vm53_vm2, %v50_v19, %v38_v39  ;;  %v60_v44 = vsel %vm53_vm2, %v48_v14, %v36_v40  ;;  %v58_v47 = vsel %vm53_vm2, %v36_v40, %v40_v28  ;;  %v536_v14 = vld [vmem:[%s1890_s3 + $0x10] sm:$0xff]  ;;  %v163_v20 = vpop.f32.mrf.mxu0 }
  0x86   :  { %1111 = vmatpush.msk.msrb.mxu1 %vm1416_vm6, %v59_v42  ;;  %1105 = vmatpush.msk.msrb.mxu0 %vm1420_vm7, %v61_v43  ;;  %v192_v22 = vpop.f32.mrf.mxu1 }
  0x87   :  { %550 = vperm.xlu2 %1216, %v536_v14  }
  0x88   :  { %1106 = vmatpush.msk.msrb.mxu0 %vm1420_vm7, %v60_v44  ;;  %1112 = vmatpush.msk.msrb.mxu1 %vm1416_vm6, %v58_v47 }
  0x89   :  { %1107 = vmatmul.msk.f32.vlgmr.msrb.gmra.mxu0 %vm133_vm0, %v121_v33  ;;  %1113 = vmatmul.msk.f32.vlgmr.msrb.gmra.mxu1 %vm133_vm0, %v121_v33 }
  0x8a   :  { %1120 = vmatmul.msk.f32.gmra.mxu2 %vm133_vm0, %v122_v48  ;;  %1126 = vmatmul.msk.f32.gmra.mxu3 %vm133_vm0, %v122_v48  ;;  %v221_v18 = vpop.f32.mrf.mxu2  ;;  %v250_v19 = vpop.f32.mrf.mxu3 }
  0x8b   :  { %1129 = vmatpush.msk.msra.mxu0 %vm1450_vm9, %v101_v51 }
  0x8c   :  { %v90_v56 = vpop.permute.xlu0 %89  ;;  %v94_v57 = vpop.permute.xlu1 %93 }
  0x8d   :  { %v99_v59 = vsel %vm95_vm8, %v86_v45, %v90_v56  ;;  %v97_v60 = vsel %vm95_vm8, %v90_v56, %v94_v57  ;;  %v103_v61 = vsel %vm95_vm8, %v94_v57, %v1380_v16  ;;  %v131_v16 = vld [vmem:[%s1889_s2 + $0x50] sm:$0xff]  ;;  %v166_v27 = vpop.f32.mrf.mxu0  ;;  %s1252_s2 = smov 512  }
  0x8e   :  { %1147 = vmatpush.msk.msra.mxu3 %vm1460_vm10, %v103_v61  ;;  %1141 = vmatpush.msk.msra.mxu2 %vm1464_vm11, %v97_v60  ;;  %v195_v28 = vpop.f32.mrf.mxu1 }
  0x8f   :  { %1135 = vmatpush.msk.msra.mxu1 %vm1468_vm12, %v99_v59 }
  0x91   :  { %1108 = vmatmul.msk.f32.gmra.mxu0 %vm133_vm0, %v122_v48  ;;  %1114 = vmatmul.msk.f32.gmra.mxu1 %vm133_vm0, %v122_v48 }
  0x92   :  { %1121 = vmatmul.msk.f32.gmra.mxu2 %vm133_vm0, %v123_v63  ;;  %1127 = vmatmul.msk.f32.gmra.mxu3 %vm133_vm0, %v123_v63  ;;  %v224_v23 = vpop.f32.mrf.mxu2 }
  0x94   :  { %v88_v0 = vpop.permute.xlu0 %87  ;;  %v92_v1 = vpop.permute.xlu1 %91 }
  0x95   :  { %v96_v2 = vsel %vm95_vm8, %v88_v0, %v92_v1  ;;  %v102_v3 = vsel %vm95_vm8, %v92_v1, %v1393_v26  ;;  %v1560_v31 = vpop.f32.mrf.mxu0 }
  0x96   :  { %1148 = vmatpush.msk.msra.mxu3 %vm1460_vm10, %v102_v3  ;;  %1142 = vmatpush.msk.msra.mxu2 %vm1464_vm11, %v96_v2  ;;  %v1562_v32 = vpop.f32.mrf.mxu1 }
  0x99   :  { %1109 = vmatmul.msk.f32.gmra.mxu0 %vm133_vm0, %v123_v63  ;;  %1115 = vmatmul.msk.f32.gmra.mxu1 %vm133_vm0, %v123_v63 }
  0x9a   :  { %1122 = vmatmul.msk.f32.gmra.mxu2 %vm133_vm0, %v124_v8  ;;  %1128 = vmatmul.msk.f32.gmra.mxu3 %vm133_vm0, %v124_v8  ;;  %v1556_v29 = vpop.f32.mrf.mxu2 }
  0x9c   :  { %v84_v10 = vpop.permute.xlu0 %83  ;;  %v1576_v51 = vpop.permute.xlu1 %555 }
  0x9d   :  { %v98_v11 = vsel %vm95_vm8, %v84_v10, %v88_v0  ;;  %v100_v12 = vsel %vm95_vm8, %v1393_v26, %v84_v10  ;;  %v253_v26 = vpop.f32.mrf.mxu3  ;;  %v1568_v35 = vpop.f32.mrf.mxu0 }
  0x9e   :  { %1130 = vmatpush.msk.msra.mxu0 %vm1450_vm9, %v100_v12  ;;  %1136 = vmatpush.msk.msra.mxu1 %vm1468_vm12, %v98_v11  ;;  %v1570_v36 = vpop.f32.mrf.mxu1 }
  0xa1   :  { %1110 = vmatmul.msk.f32.gmra.mxu0 %vm133_vm0, %v124_v8  ;;  %1116 = vmatmul.msk.f32.gmra.mxu1 %vm133_vm0, %v124_v8 }
  0xa2   :  { %1143 = vmatmul.msk.f32.vlgmr.msra.gmra.mxu2 %vm133_vm0, %v129_v13  ;;  %1149 = vmatmul.msk.f32.vlgmr.msra.gmra.mxu3 %vm133_vm0, %v129_v13  ;;  %v1564_v33 = vpop.f32.mrf.mxu2 }
  0xa4   :  { %v541_v9 = vpop.permute.xlu1 %540 }
  0xa5   :  { %v1558_v30 = vpop.f32.mrf.mxu3 }
  0xa9   :  { %1131 = vmatmul.msk.f32.vlgmr.msra.gmra.mxu0 %vm133_vm0, %v129_v13  ;;  %1137 = vmatmul.msk.f32.vlgmr.msra.gmra.mxu1 %vm133_vm0, %v129_v13 }
  0xaa   :  { %1144 = vmatmul.msk.f32.gmra.mxu2 %vm133_vm0, %v130_v15  ;;  %1150 = vmatmul.msk.f32.gmra.mxu3 %vm133_vm0, %v130_v15 }
  0xad   :  { %v1566_v34 = vpop.f32.mrf.mxu3 }
  0xb1   :  { %1132 = vmatmul.msk.f32.gmra.mxu0 %vm133_vm0, %v130_v15  ;;  %1138 = vmatmul.msk.f32.gmra.mxu1 %vm133_vm0, %v130_v15 }
  0xb2   :  { %1145 = vmatmul.msk.f32.gmra.mxu2 %vm133_vm0, %v131_v16  ;;  %1151 = vmatmul.msk.f32.gmra.mxu3 %vm133_vm0, %v131_v16 }
  0xb9   :  { %1133 = vmatmul.msk.f32.gmra.mxu0 %vm133_vm0, %v131_v16  ;;  %1139 = vmatmul.msk.f32.gmra.mxu1 %vm133_vm0, %v131_v16 }
  0xba   :  { %1146 = vmatmul.msk.f32.gmra.mxu2 %vm133_vm0, %v132_v17  ;;  %1152 = vmatmul.msk.f32.gmra.mxu3 %vm133_vm0, %v132_v17 }
  0xc1   :  { %1134 = vmatmul.msk.f32.gmra.mxu0 %vm133_vm0, %v132_v17  ;;  %1140 = vmatmul.msk.f32.gmra.mxu1 %vm133_vm0, %v132_v17 }
 0x104   :  { %v349_v39 = vpop.f32.mrf.mxu2  ;;  %v378_v40 = vpop.f32.mrf.mxu3 }
 0x105   :  { %v350_v60 = vadd.f32 %v349_v39, %v221_v18  ;;  %v379_v14 = vadd.f32 %v378_v40, %v250_v19 }
 0x106   :  { %v291_v41 = vpop.f32.mrf.mxu0  ;;  %v320_v42 = vpop.f32.mrf.mxu1 }
 0x107   :  { %v292_v61 = vadd.f32 %v291_v41, %v163_v20  ;;  %v321_v62 = vadd.f32 %v320_v42, %v192_v22  ;;  %v546_v22 = vpop.permute.xlu0 %545 }
 0x10d   :  { %v352_v43 = vpop.f32.mrf.mxu2  ;;  %v381_v44 = vpop.f32.mrf.mxu3 }
 0x10e   :  { %v294_v45 = vpop.f32.mrf.mxu0  ;;  %v323_v46 = vpop.f32.mrf.mxu1  ;;  %v353_v18 = vadd.f32 %v352_v43, %v224_v23  ;;  %v382_v43 = vadd.f32 %v381_v44, %v253_v26 }
 0x10f   :  { %v295_v39 = vadd.f32 %v294_v45, %v166_v27 }
 0x115   :  { %v1572_v47 = vpop.f32.mrf.mxu2  ;;  %v1574_v48 = vpop.f32.mrf.mxu3 }
 0x116   :  { %v297_v49 = vpop.f32.mrf.mxu0  ;;  %v326_v50 = vpop.f32.mrf.mxu1 }
 0x11d   :  { %v358_v53 = vpop.f32.mrf.mxu2  ;;  %v1578_v56 = vpop.f32.mrf.mxu3 }
 0x11e   :  { %v1580_v57 = vpop.f32.mrf.mxu1  ;;  %v1582_v59 = vpop.f32.mrf.mxu0 }
 0x125   :  { %v477_v63 = vpop.f32.mrf.mxu2  ;;  %v506_v0 = vpop.f32.mrf.mxu3 }
 0x126   :  { %v520_v1 = vadd.f32 %v477_v63, %v350_v60  ;;  %v448_v2 = vpop.f32.mrf.mxu1  ;;  %v419_v3 = vpop.f32.mrf.mxu0  ;;  %v521_v20 = vadd.f32 %v506_v0, %v379_v14  ;;  %v324_v0 = vadd.f32 %v323_v46, %v195_v28  ;;  %v327_v14 = vadd.f32 %v326_v50, %v1562_v32 }
 0x127   :  { %v519_v8 = vadd.f32 %v448_v2, %v321_v62  ;;  %v518_v10 = vadd.f32 %v419_v3, %v292_v61 }
 0x128   :  { %v560_v11 = vadd.f32 %v541_v9, %v520_v1  ;;  %v561_v23 = vadd.f32 %v541_v9, %v521_v20 }
 0x129   :  { %v558_v12 = vadd.f32 %v541_v9, %v518_v10  ;;  %v559_v13 = vadd.f32 %v541_v9, %v519_v8  ;;  %v298_v8 = vadd.f32 %v297_v49, %v1560_v31  ;;  %v356_v31 = vadd.f32 %v1572_v47, %v1556_v29 }
 0x12a   :  { %v1584_v15 = vmax.f32 %v560_v11, 0.0  ;;  %v1600_v3 = vmax.f32 %v561_v23, 0.0  ;;  %v385_v49 = vadd.f32 %v1574_v48, %v1558_v30  ;;  %v301_v29 = vadd.f32 %v1582_v59, %v1568_v35 }
 0x12b   :  { %v1586_v16 = vmax.f32 %v558_v12, 0.0  ;;  %v1588_v17 = vmax.f32 %v559_v13, 0.0  ;;  %v551_v12 = vpop.permute.xlu2 %550 }
 0x12c   :  { %606 = vrot.lane.b32.xlu2 %v1584_v15, %s1248_s25 }
 0x12d   :  { %v480_v41 = vpop.f32.mrf.mxu2  ;;  %v509_v42 = vpop.f32.mrf.mxu3  ;;  %598 = vrot.lane.b32.xlu1 %v1588_v17, %s1248_s25  ;;  %590 = vrot.lane.b32.xlu0 %v1586_v16, %s1248_s25 }
 0x12e   :  { %v524_v19 = vadd.f32 %v480_v41, %v353_v18  ;;  %v422_v40 = vpop.f32.mrf.mxu0  ;;  %v451_v60 = vpop.f32.mrf.mxu1  ;;  %v525_v1 = vadd.f32 %v509_v42, %v382_v43  ;;  %v359_v18 = vadd.f32 %v358_v53, %v1564_v33  ;;  %v388_v41 = vadd.f32 %v1578_v56, %v1566_v34 }
 0x12f   :  { %v522_v61 = vadd.f32 %v422_v40, %v295_v39  ;;  %v523_v45 = vadd.f32 %v451_v60, %v324_v0  ;;  %v330_v40 = vadd.f32 %v1580_v57, %v1570_v36 }
 0x130   :  { %v564_v62 = vadd.f32 %v546_v22, %v524_v19  ;;  %v565_v46 = vadd.f32 %v546_v22, %v525_v1 }
 0x131   :  { %v562_v63 = vadd.f32 %v546_v22, %v522_v61  ;;  %v563_v9 = vadd.f32 %v546_v22, %v523_v45 }
 0x132   :  { %v1598_v27 = vmax.f32 %v564_v62, 0.0  ;;  %v581_v39 = vmax.f32 %v565_v46, 0.0  ;;  %v721_v46 = vld [vmem:[%s1891_s4 + $0x18] sm:$0xff] }
 0x133   :  { %v1596_v2 = vmax.f32 %v562_v63, 0.0  ;;  %v1617_v42 = vmax.f32 %v563_v9, 0.0 }
 0x135   :  { %v483_v10 = vpop.f32.mrf.mxu2  ;;  %v512_v11 = vpop.f32.mrf.mxu3  ;;  %608 = vrot.lane.b32.xlu1 %v1598_v27, %s1248_s25  ;;  %592 = vrot.lane.b32.xlu2 %v1596_v2, %s1248_s25 }
 0x136   :  { %614 = vrot.lane.b32.xlu0 %v1600_v3, %s1248_s25  ;;  %v425_v26 = vpop.f32.mrf.mxu0  ;;  %v454_v28 = vpop.f32.mrf.mxu1  ;;  %v528_v22 = vadd.f32 %v483_v10, %v356_v31  ;;  %v529_v19 = vadd.f32 %v512_v11, %v385_v49 }
 0x137   :  { %v526_v44 = vadd.f32 %v425_v26, %v298_v8  ;;  %v527_v32 = vadd.f32 %v454_v28, %v327_v14  ;;  %v720_v26 = vld [vmem:[%s1891_s4 + $0x10] sm:$0xff] }
 0x138   :  { %v568_v57 = vadd.f32 %v551_v12, %v528_v22  ;;  %v569_v59 = vadd.f32 %v551_v12, %v529_v19 }
 0x139   :  { %v566_v13 = vadd.f32 %v551_v12, %v526_v44  ;;  %v567_v62 = vadd.f32 %v551_v12, %v527_v32 }
 0x13a   :  { %v584_v1 = vmax.f32 %v568_v57, 0.0  ;;  %v585_v45 = vmax.f32 %v569_v59, 0.0  ;;  %v718_v59 = vld [vmem:[%s1891_s4] sm:$0xff] }
 0x13b   :  { %v582_v20 = vmax.f32 %v566_v13, 0.0  ;;  %v583_v8 = vmax.f32 %v567_v62, 0.0 }
 0x13d   :  { %v486_v30 = vpop.f32.mrf.mxu2  ;;  %v515_v47 = vpop.f32.mrf.mxu3  ;;  %594 = vrot.lane.b32.xlu1 %v582_v20, %s1248_s25  ;;  %616 = vrot.lane.b32.xlu2 %v581_v39, %s1248_s25 }
 0x13e   :  { %v532_v33 = vadd.f32 %v486_v30, %v359_v18  ;;  %v533_v48 = vadd.f32 %v515_v47, %v388_v41  ;;  %600 = vrot.lane.b32.xlu0 %v1617_v42, %s1248_s25  ;;  %v428_v34 = vpop.f32.mrf.mxu0  ;;  %v457_v50 = vpop.f32.mrf.mxu1 }
 0x13f   :  { %v530_v53 = vadd.f32 %v428_v34, %v301_v29  ;;  %v531_v56 = vadd.f32 %v457_v50, %v330_v40 }
 0x140   :  { %v572_v36 = vadd.f32 %v1576_v51, %v532_v33  ;;  %v573_v35 = vadd.f32 %v1576_v51, %v533_v48 }
 0x141   :  { %v570_v60 = vadd.f32 %v1576_v51, %v530_v53  ;;  %v571_v61 = vadd.f32 %v1576_v51, %v531_v56  ;;  %v1028_v51 = vld [vmem:[%s1892_s5 + $0x8] sm:$0xff] }
 0x142   :  { %v588_v23 = vmax.f32 %v572_v36, 0.0  ;;  %v589_v43 = vmax.f32 %v573_v35, 0.0 }
 0x143   :  { %v586_v63 = vmax.f32 %v570_v60, 0.0  ;;  %v587_v0 = vmax.f32 %v571_v61, 0.0 }
 0x144   :  { %789 = vmatpush.msrb.mxu2 %v588_v23  ;;  %812 = vmatpush.msrb.mxu3 %v589_v43 }
 0x145   :  { %743 = vmatpush.msrb.mxu0 %v586_v63  ;;  %766 = vmatpush.msrb.mxu1 %v587_v0 }
 0x146   :  { %790 = vmatpush.msrb.mxu2 %v584_v1  ;;  %813 = vmatpush.msrb.mxu3 %v585_v45 }
 0x147   :  { %658 = vrot.lane.b32.xlu1 %v582_v20, %s1249_s18  ;;  %618 = vrot.lane.b32.xlu2 %v585_v45, %s1248_s25 }
 0x148   :  { %602 = vrot.lane.b32.xlu0 %v583_v8, %s1248_s25  ;;  %744 = vmatpush.msrb.mxu0 %v582_v20 }
 0x149   :  { %767 = vmatpush.msrb.mxu1 %v583_v8  ;;  %791 = vmatpush.msrb.mxu2 %v1598_v27 }
 0x14a   :  { %814 = vmatpush.msrb.mxu3 %v581_v39  ;;  %745 = vmatpush.msrb.mxu0 %v1596_v2 }
 0x14b   :  { %768 = vmatpush.msrb.mxu1 %v1617_v42  ;;  %792 = vmatpush.msrb.mxu2 %v1584_v15 }
 0x14c   :  { %815 = vmatpush.msrb.mxu3 %v1600_v3  ;;  %746 = vmatpush.msrb.mxu0 %v1586_v16 }
 0x14d   :  { %769 = vmatpush.msrb.mxu1 %v1588_v17  ;;  %1157 = vmatmul.msk.f32.vlgmr.msrb.gmra.mxu2 %vm724_vm13, %v720_v26 }
 0x14e   :  { %1159 = vmatmul.msk.f32.vlgmr.msrb.gmra.mxu3 %vm724_vm13, %v720_v26  ;;  %1153 = vmatmul.msk.f32.vlgmr.msrb.gmra.mxu0 %vm724_vm13, %v720_v26 }
 0x14f   :  { %610 = vrot.lane.b32.xlu1 %v584_v1, %s1248_s25  ;;  %674 = vrot.lane.b32.xlu2 %v584_v1, %s1249_s18 }
 0x150   :  { %682 = vrot.lane.b32.xlu0 %v585_v45, %s1249_s18  ;;  %1155 = vmatmul.msk.f32.vlgmr.msrb.gmra.mxu1 %vm724_vm13, %v720_v26 }
 0x155   :  { %1158 = vmatmul.msk.f32.gmra.mxu2 %vm724_vm13, %v721_v46 }
 0x156   :  { %1160 = vmatmul.msk.f32.gmra.mxu3 %vm724_vm13, %v721_v46  ;;  %1154 = vmatmul.msk.f32.gmra.mxu0 %vm724_vm13, %v721_v46 }
 0x157   :  { %660 = vrot.lane.b32.xlu1 %v586_v63, %s1249_s18  ;;  %604 = vrot.lane.b32.xlu2 %v587_v0, %s1248_s25 }
 0x158   :  { %596 = vrot.lane.b32.xlu0 %v586_v63, %s1248_s25  ;;  %1156 = vmatmul.msk.f32.gmra.mxu1 %vm724_vm13, %v721_v46 }
 0x15f   :  { %612 = vrot.lane.b32.xlu1 %v588_v23, %s1248_s25  ;;  %672 = vrot.lane.b32.xlu2 %v1598_v27, %s1249_s18 }
 0x160   :  { %680 = vrot.lane.b32.xlu0 %v581_v39, %s1249_s18 }
 0x167   :  { %656 = vrot.lane.b32.xlu1 %v1596_v2, %s1249_s18  ;;  %620 = vrot.lane.b32.xlu2 %v589_v43, %s1248_s25  ;;  %s1253_s25 = smov 32  }
 0x168   :  { %684 = vrot.lane.b32.xlu0 %v589_v43, %s1249_s18 }
 0x16f   :  { %668 = vrot.lane.b32.xlu2 %v587_v0, %s1249_s18  ;;  %654 = vrot.lane.b32.xlu1 %v1586_v16, %s1249_s18 }
 0x170   :  { %670 = vrot.lane.b32.xlu0 %v1584_v15, %s1249_s18  ;;  %v1027_v15 = vld [vmem:[%s1892_s5] sm:$0xff] }
 0x177   :  { %676 = vrot.lane.b32.xlu2 %v588_v23, %s1249_s18  ;;  %678 = vrot.lane.b32.xlu1 %v1600_v3, %s1249_s18 }
 0x178   :  { %664 = vrot.lane.b32.xlu0 %v1617_v42, %s1249_s18 }
 0x17f   :  { %666 = vrot.lane.b32.xlu2 %v583_v8, %s1249_s18  ;;  %662 = vrot.lane.b32.xlu1 %v1588_v17, %s1249_s18  ;;  %v719_v8 = vld [vmem:[%s1891_s4 + $0x8] sm:$0xff] }
 0x180   :  { %1036 = vperm.xlu0 %1217, %v1028_v51  }
 0x186   :  { %v1674_v16 = vpop.permute.xlu2 %606 }
 0x187   :  { %1031 = vperm.xlu2 %1216, %v1027_v15  }
 0x18f   :  { %v593_v2 = vpop.permute.xlu2 %592 }
 0x197   :  { %v1676_v27 = vpop.permute.xlu2 %616 }
 0x198   :  { %v635_v47 = vsel %vm53_vm2, %v1676_v27, %v593_v2 }
 0x19f   :  { %v1678_v3 = vpop.permute.xlu1 %598  ;;  %v591_v10 = vpop.permute.xlu0 %590 }
 0x1a0   :  { %v630_v33 = vsel %vm53_vm2, %v591_v10, %v1678_v3  ;;  %v626_v62 = vsel %vm53_vm2, %v1678_v3, %v1674_v16 }
 0x1a1   :  { %v619_v11 = vpop.permute.xlu2 %618 }
 0x1a7   :  { %v609_v17 = vpop.permute.xlu1 %608 }
 0x1a8   :  { %v615_v28 = vpop.permute.xlu0 %614  ;;  %v623_v61 = vsel %vm53_vm2, %v609_v17, %v1676_v27 }
 0x1a9   :  { %v1687_v44 = vpop.permute.xlu2 %674  ;;  %v634_v48 = vsel %vm53_vm2, %v615_v28, %v591_v10  ;;  %v622_v23 = vsel %vm53_vm2, %v1674_v16, %v615_v28  ;;  %v722_v28 = vld [vmem:[%s1891_s4 + $0x20] sm:$0xff] }
 0x1af   :  { %v595_v9 = vpop.permute.xlu1 %594 }
 0x1b0   :  { %v601_v12 = vpop.permute.xlu0 %600  ;;  %v636_v29 = vsel %vm53_vm2, %v619_v11, %v595_v9 }
 0x1b1   :  { %v605_v13 = vpop.permute.xlu2 %604  ;;  %v631_v32 = vsel %vm53_vm2, %v593_v2, %v601_v12  ;;  %v627_v38 = vsel %vm53_vm2, %v601_v12, %v609_v17 }
 0x1b9   :  { %v1696_v31 = vpop.permute.xlu1 %658  ;;  %v1698_v49 = vpop.permute.xlu2 %672 }
 0x1ba   :  { %v603_v14 = vpop.permute.xlu0 %602 }
 0x1bb   :  { %v632_v30 = vsel %vm53_vm2, %v595_v9, %v603_v14 }
 0x1c1   :  { %v611_v18 = vpop.permute.xlu1 %610  ;;  %v621_v20 = vpop.permute.xlu2 %620 }
 0x1c2   :  { %v683_v39 = vpop.permute.xlu0 %682  ;;  %v628_v60 = vsel %vm53_vm2, %v603_v14, %v611_v18  ;;  %v624_v37 = vsel %vm53_vm2, %v611_v18, %v619_v11 }
 0x1c3   :  { %v688_v25 = vsel %vm95_vm8, %v1687_v44, %v683_v39  ;;  %v700_v15 = vsel %vm95_vm8, %v683_v39, %v1696_v31 }
 0x1c9   :  { %v661_v41 = vpop.permute.xlu1 %660  ;;  %v669_v42 = vpop.permute.xlu2 %668 }
 0x1ca   :  { %v597_v22 = vpop.permute.xlu0 %596  ;;  %v697_v34 = vsel %vm95_vm8, %v661_v41, %v669_v42 }
 0x1cb   :  { %v633_v19 = vsel %vm53_vm2, %v597_v22, %v605_v13  ;;  %v637_v40 = vsel %vm53_vm2, %v621_v20, %v597_v22 }
 0x1cc   :  { %1161 = vmatpush.msk.msra.mxu0 %vm1420_vm7, %v637_v40  ;;  %1167 = vmatpush.msk.msra.mxu1 %vm1416_vm6, %v633_v19 }
 0x1ce   :  { %1162 = vmatpush.msk.msra.mxu0 %vm1420_vm7, %v636_v29  ;;  %1168 = vmatpush.msk.msra.mxu1 %vm1416_vm6, %v632_v30 }
 0x1d0   :  { %1163 = vmatpush.msk.msra.mxu0 %vm1420_vm7, %v635_v47  ;;  %1169 = vmatpush.msk.msra.mxu1 %vm1416_vm6, %v631_v32  ;;  %v794_v21 = vpop.f32.mrf.mxu2 }
 0x1d1   :  { %v613_v50 = vpop.permute.xlu1 %612  ;;  %v677_v53 = vpop.permute.xlu2 %676 }
 0x1d2   :  { %v625_v56 = vsel %vm53_vm2, %v613_v50, %v621_v20  ;;  %v629_v36 = vsel %vm53_vm2, %v605_v13, %v613_v50  ;;  %v693_v35 = vsel %vm95_vm8, %v669_v42, %v677_v53  ;;  %1170 = vmatpush.msk.msra.mxu1 %vm1416_vm6, %v630_v33  ;;  %v681_v57 = vpop.permute.xlu0 %680  ;;  %1164 = vmatpush.msk.msra.mxu0 %vm1420_vm7, %v634_v48  ;;  %v748_v13 = vpop.f32.mrf.mxu0 }
 0x1d3   :  { %1173 = vmatpush.msk.msra.mxu2 %vm1385_vm3, %v629_v36  ;;  %1179 = vmatpush.msk.msra.mxu3 %vm1389_vm4, %v625_v56  ;;  %v687_v16 = vsel %vm95_vm8, %v1698_v49, %v681_v57  ;;  %v817_v52 = vpop.f32.mrf.mxu3 }
 0x1d4   :  { %1185 = vmatpush.msk.msrb.mxu0 %vm1450_vm9, %v697_v34  ;;  %1191 = vmatpush.msk.msrb.mxu1 %vm1468_vm12, %v693_v35 }
 0x1d5   :  { %1174 = vmatpush.msk.msra.mxu2 %vm1385_vm3, %v628_v60  ;;  %1165 = vmatmul.msk.f32.vlgmr.msra.gmra.mxu0 %vm724_vm13, %v718_v59 }
 0x1d6   :  { %1180 = vmatpush.msk.msra.mxu3 %vm1389_vm4, %v624_v37  ;;  %1171 = vmatmul.msk.f32.vlgmr.msra.gmra.mxu1 %vm724_vm13, %v718_v59 }
 0x1d7   :  { %1175 = vmatpush.msk.msra.mxu2 %vm1385_vm3, %v627_v38 }
 0x1d8   :  { %1181 = vmatpush.msk.msra.mxu3 %vm1389_vm4, %v623_v61 }
 0x1d9   :  { %v657_v43 = vpop.permute.xlu1 %656  ;;  %v667_v63 = vpop.permute.xlu2 %666  ;;  %1176 = vmatpush.msk.msra.mxu2 %vm1385_vm3, %v626_v62 }
 0x1da   :  { %v692_v0 = vsel %vm95_vm8, %v667_v63, %v1687_v44  ;;  %v696_v1 = vsel %vm95_vm8, %v1696_v31, %v667_v63  ;;  %1182 = vmatpush.msk.msra.mxu3 %vm1389_vm4, %v622_v23  ;;  %v685_v45 = vpop.permute.xlu0 %684  ;;  %1177 = vmatmul.msk.f32.vlgmr.msra.gmra.mxu2 %vm724_vm13, %v718_v59  ;;  %v699_v2 = vsel %vm95_vm8, %v681_v57, %v657_v43  ;;  %v771_v31 = vpop.f32.mrf.mxu1 }
 0x1db   :  { %v689_v24 = vsel %vm95_vm8, %v677_v53, %v685_v45  ;;  %v701_v51 = vsel %vm95_vm8, %v685_v45, %v661_v41  ;;  %1186 = vmatpush.msk.msrb.mxu0 %vm1450_vm9, %v696_v1  ;;  %1192 = vmatpush.msk.msrb.mxu1 %vm1468_vm12, %v692_v0  ;;  %v751_v14 = vpop.f32.mrf.mxu0  ;;  %v820_v18 = vpop.f32.mrf.mxu3 }
 0x1dc   :  { %1197 = vmatpush.msk.msrb.mxu2 %vm1464_vm11, %v689_v24  ;;  %1203 = vmatpush.msk.msrb.mxu3 %vm1460_vm10, %v701_v51 }
 0x1dd   :  { %1183 = vmatmul.msk.f32.vlgmr.msra.gmra.mxu3 %vm724_vm13, %v718_v59  ;;  %1166 = vmatmul.msk.f32.gmra.mxu0 %vm724_vm13, %v719_v8 }
 0x1de   :  { %1198 = vmatpush.msk.msrb.mxu2 %vm1464_vm11, %v688_v25  ;;  %1204 = vmatpush.msk.msrb.mxu3 %vm1460_vm10, %v700_v15 }
 0x1df   :  { %1172 = vmatmul.msk.f32.gmra.mxu1 %vm724_vm13, %v719_v8 }
 0x1e0   :  { %1199 = vmatpush.msk.msrb.mxu2 %vm1464_vm11, %v687_v16  ;;  %1205 = vmatpush.msk.msrb.mxu3 %vm1460_vm10, %v699_v2 }
 0x1e1   :  { %v655_v27 = vpop.permute.xlu1 %654  ;;  %v1032_v35 = vpop.permute.xlu2 %1031 }
 0x1e2   :  { %v671_v3 = vpop.permute.xlu0 %670  ;;  %1178 = vmatmul.msk.f32.gmra.mxu2 %vm724_vm13, %v719_v8  ;;  %v774_v58 = vpop.f32.mrf.mxu1 }
 0x1e5   :  { %1184 = vmatmul.msk.f32.gmra.mxu3 %vm724_vm13, %v719_v8 }
 0x1e9   :  { %v679_v10 = vpop.permute.xlu1 %678 }
 0x1ea   :  { %v686_v11 = vsel %vm95_vm8, %v671_v3, %v679_v10  ;;  %v698_v26 = vsel %vm95_vm8, %v679_v10, %v655_v27  ;;  %v665_v17 = vpop.permute.xlu0 %664 }
 0x1eb   :  { %v691_v44 = vsel %vm95_vm8, %v665_v17, %v1698_v49  ;;  %v695_v46 = vsel %vm95_vm8, %v657_v43, %v665_v17  ;;  %1200 = vmatpush.msk.msrb.mxu2 %vm1464_vm11, %v686_v11  ;;  %1206 = vmatpush.msk.msrb.mxu3 %vm1460_vm10, %v698_v26  ;;  %v797_v49 = vpop.f32.mrf.mxu2 }
 0x1ec   :  { %1187 = vmatpush.msk.msrb.mxu0 %vm1450_vm9, %v695_v46  ;;  %1193 = vmatpush.msk.msrb.mxu1 %vm1468_vm12, %v691_v44  ;;  %v1218_v44 = vld [vmem:[%s1888_s1 + $0x30] sm:$0xff] }
 0x1ed   :  { %1201 = vmatmul.msk.f32.vlgmr.msrb.gmra.mxu2 %vm724_vm13, %v722_v28  ;;  %1207 = vmatmul.msk.f32.vlgmr.msrb.gmra.mxu3 %vm724_vm13, %v722_v28 }
 0x1f1   :  { %v663_v9 = vpop.permute.xlu1 %662 }
 0x1f2   :  { %v690_v12 = vsel %vm95_vm8, %v663_v9, %v671_v3  ;;  %v694_v55 = vsel %vm95_vm8, %v655_v27, %v663_v9  ;;  %v1219_v9 = vld [vmem:[%s1888_s1 + $0x38] sm:$0xff] }
 0x1f3   :  { %1188 = vmatpush.msk.msrb.mxu0 %vm1450_vm9, %v694_v55  ;;  %1194 = vmatpush.msk.msrb.mxu1 %vm1468_vm12, %v690_v12  ;;  %v1220_v55 = vld [vmem:[%s1888_s1 + $0x20] sm:$0xff] }
 0x1f4   :  { %1189 = vmatmul.msk.f32.vlgmr.msrb.gmra.mxu0 %vm724_vm13, %v722_v28  ;;  %1195 = vmatmul.msk.f32.vlgmr.msrb.gmra.mxu1 %vm724_vm13, %v722_v28 }
 0x1f5   :  { %1202 = vmatmul.msk.f32.gmra.mxu2 %vm724_vm13, %v723_v54  ;;  %1208 = vmatmul.msk.f32.gmra.mxu3 %vm724_vm13, %v723_v54 }
 0x1fc   :  { %1190 = vmatmul.msk.f32.gmra.mxu0 %vm724_vm13, %v723_v54  ;;  %1196 = vmatmul.msk.f32.gmra.mxu1 %vm724_vm13, %v723_v54 }
 0x252   :  { %v846_v39 = vpop.f32.mrf.mxu0 }
 0x253   :  { %v869_v41 = vpop.f32.mrf.mxu1  ;;  %v847_v32 = vadd.f32 %v846_v39, %v748_v13 }
 0x254   :  { %v870_v33 = vadd.f32 %v869_v41, %v771_v31 }
 0x25a   :  { %v849_v40 = vpop.f32.mrf.mxu0 }
 0x25b   :  { %v850_v24 = vadd.f32 %v849_v40, %v751_v14 }
 0x25c   :  { %v872_v29 = vpop.f32.mrf.mxu1 }
 0x25d   :  { %v892_v20 = vpop.f32.mrf.mxu2  ;;  %v873_v51 = vadd.f32 %v872_v29, %v774_v58 }
 0x25e   :  { %v893_v30 = vadd.f32 %v892_v20, %v794_v21  ;;  %v1221_v21 = vld [vmem:[%s1888_s1 + $0x28] sm:$0xff] }
 0x260   :  { %v915_v42 = vpop.f32.mrf.mxu3 }
 0x261   :  { %v916_v47 = vadd.f32 %v915_v42, %v817_v52 }
 0x265   :  { %v895_v22 = vpop.f32.mrf.mxu2 }
 0x266   :  { %v896_v0 = vadd.f32 %v895_v22, %v797_v49 }
 0x268   :  { %v918_v19 = vpop.f32.mrf.mxu3 }
 0x269   :  { %v919_v1 = vadd.f32 %v918_v19, %v820_v18 }
 0x270   :  { %v990_v48 = vpop.f32.mrf.mxu2  ;;  %v1013_v34 = vpop.f32.mrf.mxu3 }
 0x271   :  { %v1021_v50 = vadd.f32 %v990_v48, %v893_v30  ;;  %v1022_v53 = vadd.f32 %v1013_v34, %v916_v47  ;;  %v944_v56 = vpop.f32.mrf.mxu0  ;;  %v967_v36 = vpop.f32.mrf.mxu1 }
 0x272   :  { %v1019_v57 = vadd.f32 %v944_v56, %v847_v32  ;;  %v1020_v59 = vadd.f32 %v967_v36, %v870_v33 }
 0x273   :  { %v1041_v60 = vadd.f32 %v1032_v35, %v1021_v50  ;;  %v1042_v37 = vadd.f32 %v1032_v35, %v1022_v53 }
 0x274   :  { %v1039_v38 = vadd.f32 %v1032_v35, %v1019_v57  ;;  %v1040_v61 = vadd.f32 %v1032_v35, %v1020_v59 }
 0x275   :  { %v1049_v62 = vadd.f32 %v1041_v60, %v1306_v4  ;;  %v1050_v23 = vadd.f32 %v1042_v37, %v1313_v5  ;;  %v1037_v5 = vpop.permute.xlu0 %1036 }
 0x276   :  { %v1047_v43 = vadd.f32 %v1039_v38, %v1318_v6  ;;  %v1048_v63 = vadd.f32 %v1040_v61, %v1326_v7 }
 0x277   :  { %v1057_v45 = vmax.f32 %v1049_v62, 0.0  ;;  %v1058_v8 = vmax.f32 %v1050_v23, 0.0 }
 0x278   :  { %v1055_v25 = vmax.f32 %v1047_v43, 0.0  ;;  %v1056_v15 = vmax.f32 %v1048_v63, 0.0  ;;  %v993_v16 = vpop.f32.mrf.mxu2  ;;  %v1016_v2 = vpop.f32.mrf.mxu3 }
 0x279   :  { %1065 = vst [vmem:[#allocation2 + $0x10] sm:$0xff] %v1057_v45  ;;  %v1025_v27 = vadd.f32 %v993_v16, %v896_v0  ;;  %v1026_v3 = vadd.f32 %v1016_v2, %v919_v1  ;;  %v947_v4 = vpop.f32.mrf.mxu0  ;;  %v970_v10 = vpop.f32.mrf.mxu1 }
 0x27a   :  { %1066 = vst [vmem:[#allocation2 + $0x18] sm:$0xff] %v1058_v8  ;;  %v1023_v6 = vadd.f32 %v947_v4, %v850_v24  ;;  %v1024_v11 = vadd.f32 %v970_v10, %v873_v51 }
 0x27b   :  { %1063 = vst [vmem:[#allocation2] sm:$0xff] %v1055_v25  ;;  %v1045_v7 = vadd.f32 %v1037_v5, %v1025_v27  ;;  %v1046_v26 = vadd.f32 %v1037_v5, %v1026_v3 }
 0x27c   :  { %1064 = vst [vmem:[#allocation2 + $0x8] sm:$0xff] %v1056_v15  ;;  %v1043_v17 = vadd.f32 %v1037_v5, %v1023_v6  ;;  %v1044_v28 = vadd.f32 %v1037_v5, %v1024_v11 }
 0x27d   :  { %v1053_v46 = vadd.f32 %v1218_v44, %v1045_v7  ;;  %v1054_v12 = vadd.f32 %v1219_v9, %v1046_v26 }
 0x27e   :  { %v1051_v54 = vadd.f32 %v1220_v55, %v1043_v17  ;;  %v1052_v13 = vadd.f32 %v1221_v21, %v1044_v28 }
 0x27f   :  { %v1061_v31 = vmax.f32 %v1053_v46, 0.0  ;;  %v1062_v52 = vmax.f32 %v1054_v12, 0.0 }
 0x280   :  { %v1059_v49 = vmax.f32 %v1051_v54, 0.0  ;;  %v1060_v14 = vmax.f32 %v1052_v13, 0.0 }
 0x281   :  { %1069 = vst [vmem:[#allocation2 + $0x30] sm:$0xff] %v1061_v31 }
 0x282   :  { %1070 = vst [vmem:[#allocation2 + $0x38] sm:$0xff] %v1062_v52 }
 0x283   :  { %1067 = vst [vmem:[#allocation2 + $0x20] sm:$0xff] %v1059_v49 }
 0x284   :  { %1068 = vst [vmem:[#allocation2 + $0x28] sm:$0xff] %v1060_v14 }
 0x285   :  { %1083 = dma.vmem_to_hbm [thread:$0]  %s1076_s22, 1024, %s1078_s24, [#allocation3], %s1252_s2, %s1252_s2, %s1253_s25  }
 0x286   :  { %1246 = dma.done.wait [#allocation3], 1024  }
 0x287   :  { %1247 = vsyncadd [#allocation3], 4294966272 }
 0x288   :  { %1088 = vsyncpa [#allocation3], 1 }

</bundles_post_ra>
